<compile_context>
chip_gen: v7x
topology: tpu7x:2x2x1
jax: 0.10.0
libtpu: 0.0.40
codegen_flags: <defaults>
</compile_context>

<pallas_src>
import functools

import jax
import jax.numpy as jnp
from jax import lax
from jax.experimental import pallas as pl
from jax.experimental.pallas import tpu as pltpu


_F32 = 4
_VMEM_LIMIT_BYTES = 32 * 1024 * 1024          # scoped-VMEM cap handed to Mosaic
_DEFAULT_BLOCK_BUDGET = 24 * 1024 * 1024      # target live bytes per grid step
_ROOFLINE_KNEE = 1 << 20                      # ~1 MiB blocks reach ~85% HBM BW


# --------------------------------------------------------------------------
# Block-size heuristics (intermediate-aware VMEM estimate).
# --------------------------------------------------------------------------
def _live_bytes_per_elem(itemsize):
    # ~8 simultaneously-live f32 temporaries (x, up/down, s, d, shifted s/d,
    # gx/gy) + double-buffered input and output blocks in the I/O dtype.
    return 8 * _F32 + 4 * itemsize


def _pick_planes(n, per_plane_bytes, budget, *, sublane_aligned):
    """Largest divisor-of-`n` plane count whose live footprint fits `budget`.

    If blocks can stay past the ~1 MiB roofline knee, prefer leaving >= 4 grid
    steps so v7x's two TensorCores each get >= 2 steps (DMA/compute overlap);
    otherwise maximize the block (v5e/v6e: fewer, bigger steps).
    """
    cand = []
    for p in range(1, n + 1):
        if n % p:
            continue
        if sublane_aligned and not (p % 8 == 0 or p == n):
            continue  # (8,128) layout rule: sublane block dim 8-aligned or full
        if p * per_plane_bytes <= budget:
            cand.append(p)
    if not cand:
        return None
    pref = [p for p in cand if n // p >= 4 and p * per_plane_bytes >= _ROOFLINE_KNEE]
    return max(pref) if pref else max(cand)


def _pick_row_tile(h, per_row_bytes, budget):
    """Largest multiple-of-8 divisor of `h` (strictly < h) fitting `budget`."""
    cand = [d for d in range(8, h, 8) if h % d == 0 and d * per_row_bytes <= budget]
    return max(cand) if cand else None


# --------------------------------------------------------------------------
# Kernel bodies.
# --------------------------------------------------------------------------
def _sobel_core(x, up, down, is_left, is_right, axis, size, eps):
    """Shared separable-Sobel math; `x`, `up`, `down` are f32 and pre-scaled."""
    s = up + 2.0 * x + down          # [1, 2, 1] vertical smooth  -> feeds gx
    d = down - up                    # [-1, 0, 1] vertical diff   -> feeds gy

    def nbr(a, shift, edge):
        # a[..., j - shift] with replicate at the (static) edge mask.
        r = pltpu.roll(a, shift=shift % size, axis=axis)
        return jnp.where(edge, a, r)

    gx = nbr(s, -1, is_right) - nbr(s, 1, is_left)            # D_x * S_y
    gy = nbr(d, 1, is_left) + 2.0 * d + nbr(d, -1, is_right)  # S_x * D_y
    return jnp.sqrt(gx * gx + gy * gy + eps)


def _sobel_flat_kernel(x_ref, o_ref, *, H, W, scale, eps):
    """Narrow-image path: planes flattened to rows of length L=H*W (lane axis)."""
    x = x_ref[...].astype(jnp.float32)
    if scale != 1.0:
        x = x * scale
    L = H * W
    col = lax.broadcasted_iota(jnp.int32, (1, L), 1)       # built once per block
    cx = col % W
    is_left, is_right = cx == 0, cx == W - 1
    is_top, is_bot = col < W, col >= (H - 1) * W
    up = jnp.where(is_top, x, pltpu.roll(x, shift=W % L, axis=1))          # (y-1, x)
    down = jnp.where(is_bot, x, pltpu.roll(x, shift=(L - W) % L, axis=1))  # (y+1, x)
    o_ref[...] = _sobel_core(x, up, down, is_left, is_right,
                             axis=1, size=L, eps=eps).astype(o_ref.dtype)


def _sobel_plane_kernel(x_ref, o_ref, *, scale, eps):
    """(P, H, W) blocks, whole plane per block; replicate edges via tiny masks."""
    x = x_ref[...].astype(jnp.float32)
    if scale != 1.0:
        x = x * scale
    _, H, W = x.shape
    row = lax.broadcasted_iota(jnp.int32, (1, H, 1), 1)
    col = lax.broadcasted_iota(jnp.int32, (1, 1, W), 2)
    up = jnp.where(row == 0, x, pltpu.roll(x, shift=1, axis=1))
    down = jnp.where(row == H - 1, x, pltpu.roll(x, shift=(H - 1) % H, axis=1))
    o_ref[...] = _sobel_core(x, up, down, col == 0, col == W - 1,
                             axis=2, size=W, eps=eps).astype(o_ref.dtype)


def _sobel_htile_kernel(x_ref, up_ref, dn_ref, o_ref, *, scale, eps):
    """(1, TH, W) row-tiles with 8-row replicate halos.

    The halo index maps clamp at the image border, so the needed neighbour row
    is halo row 7 / 0 in the interior and the clamped border row (replicate) at
    the image top / bottom.
    """
    x = x_ref[...].astype(jnp.float32)
    if scale != 1.0:
        x = x * scale
    _, TH, W = x.shape
    h = pl.program_id(1)
    up_row = jnp.where(h == 0, up_ref[:, 0:1, :], up_ref[:, 7:8, :]).astype(jnp.float32)
    dn_row = jnp.where(h == pl.num_programs(1) - 1,
                       dn_ref[:, 7:8, :], dn_ref[:, 0:1, :]).astype(jnp.float32)
    if scale != 1.0:
        up_row = up_row * scale
        dn_row = dn_row * scale
    row = lax.broadcasted_iota(jnp.int32, (1, TH, 1), 1)
    col = lax.broadcasted_iota(jnp.int32, (1, 1, W), 2)
    up = jnp.where(row == 0, up_row, pltpu.roll(x, shift=1, axis=1))
    down = jnp.where(row == TH - 1, dn_row, pltpu.roll(x, shift=TH - 1, axis=1))
    o_ref[...] = _sobel_core(x, up, down, col == 0, col == W - 1,
                             axis=2, size=W, eps=eps).astype(o_ref.dtype)


# --------------------------------------------------------------------------
# pallas_call wrappers for each path.
# --------------------------------------------------------------------------
def _run_flat(x, N, H, W, P, dtype, scale, eps):
    L = H * W
    xf = x.reshape(N, L)                      # pure reshape: no HBM data movement
    kernel = functools.partial(_sobel_flat_kernel, H=H, W=W, scale=scale, eps=eps)
    out = pl.pallas_call(
        kernel,
        out_shape=jax.ShapeDtypeStruct((N, L), dtype),
        grid=(N // P,),
        in_specs=[pl.BlockSpec((P, L), lambda i: (i, 0))],
        out_specs=pl.BlockSpec((P, L), lambda i: (i, 0)),
        compiler_params=pltpu.CompilerParams(
            dimension_semantics=("parallel",),
            vmem_limit_bytes=_VMEM_LIMIT_BYTES),
    )(xf)
    return out.reshape(N, H, W)


def _run_plane(x, N, H, W, P, dtype, scale, eps):
    kernel = functools.partial(_sobel_plane_kernel, scale=scale, eps=eps)
    return pl.pallas_call(
        kernel,
        out_shape=jax.ShapeDtypeStruct((N, H, W), dtype),
        grid=(N // P,),
        in_specs=[pl.BlockSpec((P, H, W), lambda i: (i, 0, 0))],
        out_specs=pl.BlockSpec((P, H, W), lambda i: (i, 0, 0)),
        compiler_params=pltpu.CompilerParams(
            dimension_semantics=("parallel",),
            vmem_limit_bytes=_VMEM_LIMIT_BYTES),
    )(x)


def _run_htiled(x, N, H, W, TH, dtype, scale, eps):
    thb = TH // 8                 # row-tile height in 8-row layout blocks
    last_hblk = H // 8 - 1        # last 8-row block index (border clamp)
    kernel = functools.partial(_sobel_htile_kernel, scale=scale, eps=eps)
    return pl.pallas_call(
        kernel,
        out_shape=jax.ShapeDtypeStruct((N, H, W), dtype),
        grid=(N, H // TH),
        in_specs=[
            pl.BlockSpec((1, TH, W), lambda n, h: (n, h, 0)),
            # 8-row halo above the tile (clamped to the top border -> replicate)
            pl.BlockSpec((1, 8, W),
                         lambda n, h: (n, jnp.maximum(h * thb - 1, 0), 0)),
            # 8-row halo below the tile (clamped to the bottom border)
            pl.BlockSpec((1, 8, W),
                         lambda n, h: (n, jnp.minimum((h + 1) * thb, last_hblk), 0)),
        ],
        out_specs=pl.BlockSpec((1, TH, W), lambda n, h: (n, h, 0)),
        compiler_params=pltpu.CompilerParams(
            dimension_semantics=("parallel", "parallel"),
            vmem_limit_bytes=_VMEM_LIMIT_BYTES),
    )(x, x, x)


# --------------------------------------------------------------------------
# Public entry point.
# --------------------------------------------------------------------------
def sobel_pallas(image, normalized: bool = True, eps: float = 1e-6, *,
                 max_block_bytes=None):
    """image: (B, C, H, W) -> (B, C, H, W) Sobel edge magnitude per channel."""
    B, C, H, W = map(int, image.shape)
    N = B * C
    scale = (1.0 / 8.0) if normalized else 1.0   # L1 norm of each Sobel kernel = 8
    eps = float(eps)
    dtype = image.dtype
    itemsize = jnp.dtype(dtype).itemsize
    budget = _DEFAULT_BLOCK_BUDGET if max_block_bytes is None else int(max_block_bytes)

    per_elem = _live_bytes_per_elem(itemsize)
    plane_live = H * W * per_elem
    x = image.reshape(N, H, W)

    # Narrow planes: flatten H into the lane axis (pure reshape, no extra HBM
    # traffic) so vregs/stores are lane-dense even when W << 128.
    if W < 128 and plane_live <= budget:
        P = _pick_planes(N, plane_live, budget, sublane_aligned=True)
        if P is not None:
            out = _run_flat(x, N, H, W, P, dtype, scale, eps)
            return out.reshape(B, C, H, W)

    # Planes that fit in one block: whole-plane blocks, several per grid step.
    if plane_live <= budget:
        P = _pick_planes(N, plane_live, budget, sublane_aligned=False)
        out = _run_plane(x, N, H, W, P, dtype, scale, eps)
        return out.reshape(B, C, H, W)

    # Large planes: tile along H with replicate halos.
    TH = _pick_row_tile(H, W * per_elem, budget) if H % 8 == 0 else None
    if TH is None:
        # TODO(synk): H not a multiple of 8 (or with no VMEM-sized multiple-of-8
        # divisor) is not row-tiled; fall back to whole-plane blocks, which may
        # exceed the VMEM budget for extreme shapes.
        out = _run_plane(x, N, H, W, 1, dtype, scale, eps)
    else:
        out = _run_htiled(x, N, H, W, TH, dtype, scale, eps)
    return out.reshape(B, C, H, W)


# --------------------------------------------------------------------------
# Pure-JAX reference (mirrors the PyTorch conv3d formulation).
# --------------------------------------------------------------------------
_KX = ((-1.0, 0.0, 1.0),
       (-2.0, 0.0, 2.0),
       (-1.0, 0.0, 1.0))


def _sobel_reference(image, normalized: bool = True, eps: float = 1e-6):
    B, C, H, W = image.shape
    scale = (1.0 / 8.0) if normalized else 1.0
    xp = jnp.pad(image, ((0, 0), (0, 0), (1, 1), (1, 1)), mode="edge").astype(jnp.float32)
    gx = jnp.zeros((B, C, H, W), jnp.float32)
    gy = jnp.zeros((B, C, H, W), jnp.float32)
    for dy in range(3):
        for dx in range(3):
            win = xp[:, :, dy:dy + H, dx:dx + W]
            gx = gx + (_KX[dy][dx] * scale) * win
            gy = gy + (_KX[dx][dy] * scale) * win
    return jnp.sqrt(gx * gx + gy * gy + eps).astype(image.dtype)


if __name__ == "__main__":
    key = jax.random.PRNGKey(0)
    k1, k2, k3 = jax.random.split(key, 3)

    # Narrow path: W < 128 -> flattened lane-dense kernel (pure reshapes only).
    x1 = jax.random.uniform(k1, (2, 4, 16, 16), dtype=jnp.float32)
    o1 = jax.block_until_ready(sobel_pallas(x1, normalized=True, eps=1e-6))
    r1 = _sobel_reference(x1, normalized=True, eps=1e-6)
    assert o1.shape == x1.shape, o1.shape
    assert jnp.allclose(o1, r1, atol=1e-5, rtol=1e-5), "mismatch (flattened path)"

    # Wide path: W >= 128 -> whole-plane blocks (also covers unnormalized scale).
    x2 = jax.random.uniform(k2, (1, 3, 8, 128), dtype=jnp.float32)
    o2 = jax.block_until_ready(sobel_pallas(x2, normalized=False, eps=1e-6))
    r2 = _sobel_reference(x2, normalized=False, eps=1e-6)
    assert jnp.allclose(o2, r2, atol=1e-4, rtol=1e-5), "mismatch (plane path)"

    # H-tiled path: a small block budget forces row tiles + replicate halo blocks.
    x3 = jax.random.uniform(k3, (1, 2, 64, 256), dtype=jnp.float32)
    o3 = jax.block_until_ready(sobel_pallas(x3, max_block_bytes=256 * 1024))
    r3 = _sobel_reference(x3)
    assert jnp.allclose(o3, r3, atol=1e-5, rtol=1e-5), "mismatch (H-tiled path)"

    print("KERNEL_OK")
</pallas_src>

<mosaic_0001>
module attributes {stable_mosaic.version = 11 : i64} {
  func.func @_sobel_flat_kernel(%arg0: i32, %arg1: memref<8x256xf32, #tpu.memory_space<vmem>>, %arg2: memref<8x256xf32, #tpu.memory_space<vmem>>) attributes {dimension_semantics = [#tpu.dimension_semantics<parallel>], iteration_bounds = array<i64: 1>, scalar_prefetch = 0 : i64, scratch_operands = 0 : i64, tpu.core_type = #tpu.core_type<tc>, window_params = [{transform_indices = @transform_0, window_bounds = array<i64: 8, 256>}, {transform_indices = @transform_1, window_bounds = array<i64: 8, 256>}]} {
    %c0 = arith.constant 0 : index
    %c0_0 = arith.constant 0 : index
    %0 = vector.load %arg1[%c0, %c0_0] : memref<8x256xf32, #tpu.memory_space<vmem>>, vector<8x256xf32>
    %cst = arith.constant 1.250000e-01 : f32
    %1 = vector.broadcast %cst : f32 to vector<8x256xf32>
    %2 = arith.mulf %0, %1 : vector<8x256xf32>
    %3 = tpu.iota {dimensions = array<i32: 1>} : vector<1x256xi32>
    %c16_i32 = arith.constant 16 : i32
    %c0_i32 = arith.constant 0 : i32
    %4 = arith.cmpi eq, %c16_i32, %c0_i32 : i32
    %c1_i32 = arith.constant 1 : i32
    %5 = arith.select %4, %c1_i32, %c16_i32 : i32
    %6 = vector.broadcast %5 : i32 to vector<1x256xi32>
    %7 = arith.remsi %3, %6 : vector<1x256xi32>
    %c0_i32_1 = arith.constant 0 : i32
    %8 = vector.broadcast %c0_i32_1 : i32 to vector<1x256xi32>
    %9 = arith.cmpi ne, %7, %8 : vector<1x256xi32>
    %c0_i32_2 = arith.constant 0 : i32
    %10 = vector.broadcast %c0_i32_2 : i32 to vector<1x256xi32>
    %11 = arith.cmpi slt, %7, %10 : vector<1x256xi32>
    %c0_i32_3 = arith.constant 0 : i32
    %12 = arith.cmpi slt, %5, %c0_i32_3 : i32
    %13 = vector.broadcast %12 : i1 to vector<1x256xi1>
    %14 = vector.broadcast %13 : vector<1x256xi1> to vector<1x256xi1>
    %15 = arith.xori %11, %14 : vector<1x256xi1>
    %16 = arith.andi %15, %9 : vector<1x256xi1>
    %17 = vector.broadcast %5 : i32 to vector<1x256xi32>
    %18 = arith.addi %7, %17 : vector<1x256xi32>
    %19 = arith.select %16, %18, %7 : vector<1x256xi1>, vector<1x256xi32>
    %c0_i32_4 = arith.constant 0 : i32
    %20 = vector.broadcast %c0_i32_4 : i32 to vector<1x256xi32>
    %21 = arith.cmpi eq, %19, %20 : vector<1x256xi32>
    %c15_i32 = arith.constant 15 : i32
    %22 = vector.broadcast %c15_i32 : i32 to vector<1x256xi32>
    %23 = arith.cmpi eq, %19, %22 : vector<1x256xi32>
    %c16_i32_5 = arith.constant 16 : i32
    %24 = vector.broadcast %c16_i32_5 : i32 to vector<1x256xi32>
    %25 = arith.cmpi slt, %3, %24 : vector<1x256xi32>
    %c240_i32 = arith.constant 240 : i32
    %26 = vector.broadcast %c240_i32 : i32 to vector<1x256xi32>
    %27 = arith.cmpi sge, %3, %26 : vector<1x256xi32>
    %c16_i32_6 = arith.constant 16 : i32
    %28 = tpu.dynamic_rotate %2 by %c16_i32_6 dim 1 : vector<8x256xf32>, i32 -> vector<8x256xf32>
    %29 = vector.shape_cast %25 : vector<1x256xi1> to vector<1x256xi1>
    %30 = vector.broadcast %29 : vector<1x256xi1> to vector<8x256xi1>
    %31 = arith.select %30, %2, %28 : vector<8x256xi1>, vector<8x256xf32>
    %c240_i32_7 = arith.constant 240 : i32
    %32 = tpu.dynamic_rotate %2 by %c240_i32_7 dim 1 : vector<8x256xf32>, i32 -> vector<8x256xf32>
    %33 = vector.shape_cast %27 : vector<1x256xi1> to vector<1x256xi1>
    %34 = vector.broadcast %33 : vector<1x256xi1> to vector<8x256xi1>
    %35 = arith.select %34, %2, %32 : vector<8x256xi1>, vector<8x256xf32>
    %cst_8 = arith.constant 2.000000e+00 : f32
    %36 = vector.broadcast %cst_8 : f32 to vector<8x256xf32>
    %37 = arith.mulf %36, %2 : vector<8x256xf32>
    %38 = arith.addf %31, %37 : vector<8x256xf32>
    %39 = arith.addf %38, %35 : vector<8x256xf32>
    %40 = arith.subf %35, %31 : vector<8x256xf32>
    %c255_i32 = arith.constant 255 : i32
    %41 = tpu.dynamic_rotate %39 by %c255_i32 dim 1 : vector<8x256xf32>, i32 -> vector<8x256xf32>
    %42 = vector.shape_cast %23 : vector<1x256xi1> to vector<1x256xi1>
    %43 = vector.broadcast %42 : vector<1x256xi1> to vector<8x256xi1>
    %44 = arith.select %43, %39, %41 : vector<8x256xi1>, vector<8x256xf32>
    %c1_i32_9 = arith.constant 1 : i32
    %45 = tpu.dynamic_rotate %39 by %c1_i32_9 dim 1 : vector<8x256xf32>, i32 -> vector<8x256xf32>
    %46 = vector.shape_cast %21 : vector<1x256xi1> to vector<1x256xi1>
    %47 = vector.broadcast %46 : vector<1x256xi1> to vector<8x256xi1>
    %48 = arith.select %47, %39, %45 : vector<8x256xi1>, vector<8x256xf32>
    %49 = arith.subf %44, %48 : vector<8x256xf32>
    %c1_i32_10 = arith.constant 1 : i32
    %50 = tpu.dynamic_rotate %40 by %c1_i32_10 dim 1 : vector<8x256xf32>, i32 -> vector<8x256xf32>
    %51 = vector.shape_cast %21 : vector<1x256xi1> to vector<1x256xi1>
    %52 = vector.broadcast %51 : vector<1x256xi1> to vector<8x256xi1>
    %53 = arith.select %52, %40, %50 : vector<8x256xi1>, vector<8x256xf32>
    %cst_11 = arith.constant 2.000000e+00 : f32
    %54 = vector.broadcast %cst_11 : f32 to vector<8x256xf32>
    %55 = arith.mulf %54, %40 : vector<8x256xf32>
    %56 = arith.addf %53, %55 : vector<8x256xf32>
    %c255_i32_12 = arith.constant 255 : i32
    %57 = tpu.dynamic_rotate %40 by %c255_i32_12 dim 1 : vector<8x256xf32>, i32 -> vector<8x256xf32>
    %58 = vector.shape_cast %23 : vector<1x256xi1> to vector<1x256xi1>
    %59 = vector.broadcast %58 : vector<1x256xi1> to vector<8x256xi1>
    %60 = arith.select %59, %40, %57 : vector<8x256xi1>, vector<8x256xf32>
    %61 = arith.addf %56, %60 : vector<8x256xf32>
    %62 = arith.mulf %49, %49 : vector<8x256xf32>
    %63 = arith.mulf %61, %61 : vector<8x256xf32>
    %64 = arith.addf %62, %63 : vector<8x256xf32>
    %cst_13 = arith.constant 9.99999997E-7 : f32
    %65 = vector.broadcast %cst_13 : f32 to vector<8x256xf32>
    %66 = arith.addf %64, %65 : vector<8x256xf32>
    %67 = math.sqrt %66 : vector<8x256xf32>
    %c0_14 = arith.constant 0 : index
    %c0_15 = arith.constant 0 : index
    %68 = vector.load %arg2[%c0_14, %c0_15] : memref<8x256xf32, #tpu.memory_space<vmem>>, vector<8x256xf32>
    tpu.vector_store %arg2[%c0_14, %c0_15], %67 {strides = array<i32>} : memref<8x256xf32, #tpu.memory_space<vmem>>, vector<8x256xf32>,
    return
  }
  func.func @transform_0(%arg0: i32) -> (i32, i32) {
    %c0_i32 = arith.constant 0 : i32
    %c0_i32_0 = arith.constant 0 : i32
    return %arg0, %c0_i32 : i32, i32
  }
  func.func @transform_1(%arg0: i32) -> (i32, i32) {
    %c0_i32 = arith.constant 0 : i32
    %c0_i32_0 = arith.constant 0 : i32
    return %arg0, %c0_i32 : i32, i32
  }
}

</mosaic_0001>

<bundles_post_ra>
// kernel: tpu_custom_call.1
= control target key start
LH: loop header
LB: loop body
LE: loop exit
PB: predicated region body
PF: predicated region fallthrough
CT: control target
= control target key end

     0   :  { %6 = vsyncpa [#allocation3], 0  ;;  %s336_s0 = inlined_call_operand.hbm [shape: f32[8,256], index: 0, kind: input, shape index: {}]   ;;  %s337_s1 = inlined_call_operand.hbm [shape: f32[8,256], index: 1, kind: output, shape index: {}]  }
   0x1   :  { %7 = vsyncpa [#allocation4], 0  ;;  %s240_s6 = smov [#allocation2]   ;;  %s192_s10 = scalar_lea.hbm %s336_s0, 256 }
   0x2   :  { %s14_s7 = sshll.u32 %s240_s6, 4  ;;  %p193_p0 = scmp.ne.s32.totalorder %s336_s0, %s192_s10  ;;  %s15_s7 = int_to_ptr.vmem [resolvable:$true] %s14_s7 }
   0x3   :  { %p196_p1 = scmp.lt.u32.totalorder %s192_s10, %s336_s0 }
   0x5   :  { %p198_p2 = pnand %p196_p1, %p193_p0 }
   0x7   :  { %201 = shalt.err (!%p198_p2)
}
   0x8   :  { %s202_s15 = scalar_lea.vmem %s15_s7, 256  ;;  %p207_p4 = scmp.lt.s32.totalorder %s15_s7, %s15_s7 }
   0x9   :  { %p203_p3 = scmp.ne.s32.totalorder %s15_s7, %s202_s15  ;;  %p208_p5 = scmp.lt.s32.totalorder %s202_s15, %s202_s15 }
   0xb   :  { %p209_p6 = por %p208_p5, %p207_p4 }
   0xd   :  { %p210_p7 = pnand %p209_p6, %p203_p3 }
   0xf   :  { %213 = shalt.err (!%p210_p7)
}
  0x10   :  { %17 = dma.hbm_to_vmem [thread:$0]  %s336_s0, 256, %s15_s7, [#allocation3]  }
  0x11   :  { %236 = dma.done.wait [#allocation3], 256  }
  0x12   :  { %237 = vsyncadd [#allocation3], 4294967040  ;;  %v21_v0 = vld [vmem:[#allocation2] sm:$0xff]  ;;  %v22_v1 = vld [vmem:[#allocation2 + $0x8] sm:$0xff]  ;;  %s241_s18 = smov 112   ;;  %s242_s19 = smov 16   ;;  %v25_v4 = vlaneseq }
  0x13   :  { %v23_v2 = vmul.f32 0.125, %v21_v0  ;;  %v24_v3 = vmul.f32 0.125, %v22_v1  ;;  %s243_s0 = smov 1   ;;  %s244_s20 = smov 127  }
  0x14   :  { %v268_v5 = vand.u32 127, %v25_v4  ;;  %s245_s21 = smov [#allocation5]  }
  0x15   :  { %72 = vrot.lane.b32.xlu1 %v23_v2, %s241_s18  ;;  %60 = vrot.lane.b32.xlu0 %v23_v2, %s242_s19  ;;  %v86_v9 = vmul.f32 2.0, %v24_v3  ;;  %v85_v10 = vmul.f32 2.0, %v23_v2  ;;  %s173_s22 = sshll.u32 %s245_s21, 4  ;;  %s174_s22 = int_to_ptr.vmem [resolvable:$true] %s173_s22 }
  0x16   :  { %v27_v6 = vadd.s32 128, %v268_v5  ;;  %vm76_vm0 = vcmp.lt.s32.totalorder %v268_v5, 112  ;;  %vm56_vm1 = vcmp.lt.s32.totalorder %v268_v5, 16  ;;  %v32_v27 = vand.u32 15, %v268_v5  ;;  %s214_s23 = scalar_lea.vmem %s174_s22, 256  ;;  %p219_p9 = scmp.lt.s32.totalorder %s174_s22, %s174_s22 }
  0x17   :  { %vm110_vm3 = vcmp.lt.s32.totalorder %v268_v5, 1  ;;  %vm97_vm6 = vcmp.lt.s32.totalorder %v268_v5, 127  ;;  %p215_p8 = scmp.ne.s32.totalorder %s174_s22, %s214_s23  ;;  %p220_p10 = scmp.lt.s32.totalorder %s214_s23, %s214_s23 }
  0x18   :  { %vm59_vm2 = vcmp.ge.s32.totalorder %v27_v6, 240  ;;  %v39_v28 = vand.u32 15, %v27_v6  ;;  %vm275_vm4 = vcmp.eq.s32.totalorder %v32_v27, 0  ;;  %vm292_vm7 = vcmp.eq.s32.totalorder %v32_v27, 15 }
  0x19   :  { %74 = vrot.lane.b32.xlu1 %v24_v3, %s241_s18  ;;  %62 = vrot.lane.b32.xlu0 %v24_v3, %s242_s19  ;;  %p221_p11 = por %p220_p10, %p219_p9 }
  0x1a   :  { %vm279_vm5 = vcmp.eq.s32.totalorder %v39_v28, 0  ;;  %vm296_vm8 = vcmp.eq.s32.totalorder %v39_v28, 15 }
  0x1b   :  { %p222_p12 = pnand %p221_p11, %p215_p8 }
  0x87   :  { %v73_v7 = vpop.permute.xlu1 %72  ;;  %v61_v8 = vpop.permute.xlu0 %60 }
  0x8b   :  { %v75_v11 = vpop.permute.xlu1 %74  ;;  %v63_v12 = vpop.permute.xlu0 %62 }
  0x8c   :  { %v77_v13 = vsel %vm76_vm0, %v73_v7, %v75_v11  ;;  %v78_v14 = vsel %vm76_vm0, %v75_v11, %v73_v7  ;;  %v64_v15 = vsel %vm56_vm1, %v61_v8, %v63_v12  ;;  %v65_v16 = vsel %vm56_vm1, %v63_v12, %v61_v8 }
  0x8d   :  { %v84_v17 = vsel %vm59_vm2, %v24_v3, %v78_v14  ;;  %v70_v18 = vsel %vm56_vm1, %v23_v2, %v65_v16  ;;  %v88_v20 = vadd.f32 %v86_v9, %v64_v15 }
  0x8e   :  { %v87_v19 = vadd.f32 %v85_v10, %v70_v18  ;;  %v91_v21 = vsub.f32 %v77_v13, %v70_v18  ;;  %v92_v22 = vsub.f32 %v84_v17, %v64_v15 }
  0x8f   :  { %v90_v24 = vadd.f32 %v88_v20, %v84_v17 }
  0x90   :  { %121 = vrot.lane.b32.xlu0 %v91_v21, %s243_s0  ;;  %123 = vrot.lane.b32.xlu1 %v92_v22, %s243_s0  ;;  %v89_v23 = vadd.f32 %v87_v19, %v77_v13  ;;  %v129_v45 = vmul.f32 2.0, %v91_v21  ;;  %v130_v46 = vmul.f32 2.0, %v92_v22 }
  0x94   :  { %95 = vrot.lane.b32.xlu1 %v90_v24, %s244_s20  ;;  %93 = vrot.lane.b32.xlu0 %v89_v23, %s244_s20 }
  0x98   :  { %108 = vrot.lane.b32.xlu1 %v90_v24, %s243_s0  ;;  %106 = vrot.lane.b32.xlu0 %v89_v23, %s243_s0 }
  0x9c   :  { %135 = vrot.lane.b32.xlu1 %v92_v22, %s244_s20  ;;  %133 = vrot.lane.b32.xlu0 %v91_v21, %s244_s20 }
 0x102   :  { %v122_v25 = vpop.permute.xlu0 %121  ;;  %v124_v26 = vpop.permute.xlu1 %123 }
 0x103   :  { %v125_v33 = vsel %vm110_vm3, %v122_v25, %v124_v26  ;;  %v126_v34 = vsel %vm110_vm3, %v124_v26, %v122_v25 }
 0x104   :  { %v127_v35 = vsel %vm275_vm4, %v91_v21, %v126_v34  ;;  %v128_v36 = vsel %vm279_vm5, %v92_v22, %v125_v33 }
 0x105   :  { %v131_v49 = vadd.f32 %v129_v45, %v127_v35  ;;  %v132_v50 = vadd.f32 %v130_v46, %v128_v36 }
 0x106   :  { %v96_v29 = vpop.permute.xlu1 %95  ;;  %v94_v30 = vpop.permute.xlu0 %93 }
 0x107   :  { %v98_v41 = vsel %vm97_vm6, %v94_v30, %v96_v29  ;;  %v99_v42 = vsel %vm97_vm6, %v96_v29, %v94_v30 }
 0x108   :  { %v104_v51 = vsel %vm292_vm7, %v89_v23, %v98_v41  ;;  %v105_v52 = vsel %vm296_vm8, %v90_v24, %v99_v42 }
 0x10a   :  { %v109_v39 = vpop.permute.xlu1 %108  ;;  %v107_v40 = vpop.permute.xlu0 %106 }
 0x10b   :  { %v111_v43 = vsel %vm110_vm3, %v107_v40, %v109_v39  ;;  %v112_v44 = vsel %vm110_vm3, %v109_v39, %v107_v40 }
 0x10c   :  { %v117_v47 = vsel %vm275_vm4, %v89_v23, %v112_v44  ;;  %v118_v48 = vsel %vm279_vm5, %v90_v24, %v111_v43 }
 0x10d   :  { %v119_v55 = vsub.f32 %v104_v51, %v117_v47  ;;  %v120_v56 = vsub.f32 %v105_v52, %v118_v48 }
 0x10e   :  { %v136_v53 = vpop.permute.xlu1 %135  ;;  %v134_v54 = vpop.permute.xlu0 %133 }
 0x10f   :  { %v137_v57 = vsel %vm97_vm6, %v134_v54, %v136_v53  ;;  %v138_v58 = vsel %vm97_vm6, %v136_v53, %v134_v54  ;;  %v143_v63 = vmul.f32 %v119_v55, %v119_v55  ;;  %v144_v0 = vmul.f32 %v120_v56, %v120_v56 }
 0x110   :  { %v139_v59 = vsel %vm292_vm7, %v91_v21, %v137_v57  ;;  %v140_v60 = vsel %vm296_vm8, %v92_v22, %v138_v58 }
 0x111   :  { %v141_v61 = vadd.f32 %v139_v59, %v131_v49  ;;  %v142_v62 = vadd.f32 %v140_v60, %v132_v50 }
 0x113   :  { %v145_v1 = vmul.f32 %v141_v61, %v141_v61  ;;  %v146_v2 = vmul.f32 %v142_v62, %v142_v62 }
 0x115   :  { %v147_v3 = vadd.f32 %v145_v1, %v143_v63  ;;  %v148_v4 = vadd.f32 %v146_v2, %v144_v0 }
 0x117   :  { %v149_v6 = vadd.f32 1e-06, %v147_v3  ;;  %v150_v7 = vadd.f32 1e-06, %v148_v4 }
 0x119   :  { %188 = vrsqrt.f32 %v149_v6  ;;  %vm153_vm9 = vcmp.eq.f32.partialorder %v149_v6, inf  ;;  %v156_v10 = vand.u32 2147483648, %v149_v6  ;;  %vm155_vm10 = vcmp.eq.f32.partialorder %v149_v6, 0.0 }
 0x11a   :  { %190 = vrsqrt.f32 %v150_v7  ;;  %vm160_vm11 = vcmp.eq.f32.partialorder %v150_v7, inf  ;;  %v163_v13 = vand.u32 2147483648, %v150_v7  ;;  %vm162_vm12 = vcmp.eq.f32.partialorder %v150_v7, 0.0 }
 0x123   :  { %v189_v5 = vpop.eup %188 }
 0x124   :  { %v191_v8 = vpop.eup %190  ;;  %v152_v9 = vmul.f32 %v189_v5, %v149_v6 }
 0x125   :  { %v159_v11 = vmul.f32 %v191_v8, %v150_v7 }
 0x126   :  { %v154_v12 = vsel %vm153_vm9, %v149_v6, %v152_v9 }
 0x127   :  { %v157_v14 = vsel %vm155_vm10, %v156_v10, %v154_v12  ;;  %v161_v15 = vsel %vm160_vm11, %v150_v7, %v159_v11 }
 0x128   :  { %v164_v16 = vsel %vm162_vm12, %v163_v13, %v161_v15  ;;  %165 = vst [vmem:[#allocation5] sm:$0xff] %v157_v14 }
 0x129   :  { %166 = vst [vmem:[#allocation5 + $0x8] sm:$0xff] %v164_v16 }
 0x12a   :  { %225 = shalt.err (!%p222_p12)
}
 0x12b   :  { %s226_s26 = scalar_lea.hbm %s337_s1, 256 }
 0x12c   :  { %p227_p13 = scmp.ne.s32.totalorder %s337_s1, %s226_s26  ;;  %p230_p0 = scmp.lt.u32.totalorder %s226_s26, %s337_s1 }
 0x12e   :  { %p232_p1 = pnand %p230_p0, %p227_p13 }
 0x130   :  { %235 = shalt.err (!%p232_p1)
}
 0x131   :  { %176 = dma.vmem_to_hbm [thread:$0]  %s174_s22, 256, %s337_s1, [#allocation4]  }
 0x132   :  { %238 = dma.done.wait [#allocation4], 256  }
 0x133   :  { %239 = vsyncadd [#allocation4], 4294967040 }
 0x134   :  { %180 = vsyncpa [#allocation3], 1 }
 0x135   :  { %181 = vsyncpa [#allocation4], 1 }

</bundles_post_ra>
